<compile_context>
chip_gen: v7x
topology: tpu7x:2x2x1
jax: 0.10.0
libtpu: 0.0.40
codegen_flags: <defaults>
</compile_context>

<pallas_src>
import functools

import jax
import jax.numpy as jnp
from jax.experimental import pallas as pl
from jax.experimental.pallas import tpu as pltpu

CIN = 3
COUT = 64
KH = KW = 3
KKC = KH * KW * CIN  # 27


def _conv3x3_kernel(x_ref, w_ref, o_ref, *, W, OH, OW):
    # x_ref: (1, CIN, H*W)    NCHW with each channel's rows flat on the lane axis
    # w_ref: (COUT, KKC + 1)  packed weights, column k = (kh*KW + kw)*CIN + c,
    #                         last column = bias (fold), compute dtype
    # o_ref: (1, COUT, OH*OW) channel-major, lane-dense output
    xf = x_ref[0].astype(w_ref.dtype)  # (CIN, H*W)

    # Full-width im2col, transposed: tap (kh, kw) is one contiguous lane slice.
    #   patch_fw[(kh*KW+kw)*CIN + c, oh*W + ow] = x[c, oh+kh, ow+kw]
    # Mp = OH*W - (KW-1) keeps the largest tap slice exactly in bounds.
    Mp = OH * W - (KW - 1)
    taps = [
        xf[:, kh * W + kw: kh * W + kw + Mp]      # (CIN, Mp) contiguous slice
        for kh in range(KH) for kw in range(KW)
    ]
    patch = jnp.concatenate(taps, axis=0)         # (27, Mp)  K on sublanes

    # Drop the KW-1 wrap-around junk columns at the end of each output row,
    # compacting oh*W + ow  ->  oh*OW + ow.  Done on the 27-row patch (cheaper
    # than relayouting the 64-row output) and entirely in VMEM.
    patch = jnp.concatenate(
        [patch[:, oh * W: oh * W + OW] for oh in range(OH)], axis=1
    )                                             # (27, OH*OW)

    # Bias fold: ones row -> K = 28 (same 32-sublane MXU tile as 27).
    ones = jnp.ones((1, OH * OW), dtype=patch.dtype)
    patch = jnp.concatenate([patch, ones], axis=0)  # (28, OH*OW)

    # Single MXU contraction, f32 accumulation: (COUT, 28) @ (28, M).
    acc = jnp.dot(w_ref[...], patch, preferred_element_type=jnp.float32)

    # Channel-major, lane-dense store — wrapper reshape to NCHW is free.
    o_ref[0] = acc.astype(o_ref.dtype)            # (COUT, OH*OW)


def lhmd_forward(x_nchw, w_oihw, bias, *,
                 compute_dtype=jnp.float32, out_dtype=None):
    """Conv2d(3, 64, kernel_size=3), stride 1, no padding (PyTorch defaults).

    compute_dtype: matmul operand dtype (bf16 recommended on v6e/v7x; f32
                   accumulation is kept either way).
    out_dtype:     output/store dtype (bf16 halves writeback HBM traffic on
                   v6e/v7x); defaults to the input dtype.
    """
    N, C, H, W = x_nchw.shape
    assert C == CIN
    OH, OW = H - KH + 1, W - KW + 1
    out_dtype = x_nchw.dtype if out_dtype is None else out_dtype

    # Free contiguous reshape (bitcast): channel rows land flat on the lane axis.
    x_flat = x_nchw.reshape(N, CIN, H * W)

    # Pack weights (tiny): w_packed[o, (kh*KW+kw)*CIN + c] = w[o, c, kh, kw],
    # then append the bias column for the in-matmul bias fold.
    w_packed = jnp.transpose(w_oihw, (0, 2, 3, 1)).reshape(COUT, KKC)
    w_full = jnp.concatenate([w_packed, bias.reshape(COUT, 1)], axis=1)
    w_full = w_full.astype(compute_dtype)

    kernel = functools.partial(_conv3x3_kernel, W=W, OH=OH, OW=OW)

    out = pl.pallas_call(
        kernel,
        out_shape=jax.ShapeDtypeStruct((N, COUT, OH * OW), out_dtype),
        grid_spec=pltpu.PrefetchScalarGridSpec(
            num_scalar_prefetch=0,
            grid=(N,),
            in_specs=[
                pl.BlockSpec((1, CIN, H * W), lambda n: (n, 0, 0)),
                pl.BlockSpec((COUT, KKC + 1), lambda n: (0, 0)),
            ],
            out_specs=pl.BlockSpec((1, COUT, OH * OW), lambda n: (n, 0, 0)),
        ),
        compiler_params=pltpu.CompilerParams(
            dimension_semantics=("parallel",),
        ),
    )(x_flat, w_full)

    # Free contiguous reshape to PyTorch-style NCHW — no HBM transpose pass.
    return out.reshape(N, COUT, OH, OW)


if __name__ == "__main__":
    key = jax.random.PRNGKey(0)
    kx, kw, kb = jax.random.split(key, 3)

    # Small, deterministic synthetic shapes consistent with Conv2d(3, 64, k=3)
    N, H, W = 2, 16, 16
    x = jax.random.normal(kx, (N, CIN, H, W), dtype=jnp.float32)
    # PyTorch stores conv weights as (out, in, kh, kw)
    w = jax.random.normal(kw, (COUT, CIN, KH, KW), dtype=jnp.float32) * 0.05
    b = jax.random.normal(kb, (COUT,), dtype=jnp.float32) * 0.05

    out = jax.block_until_ready(lhmd_forward(x, w, b))

    # Silent correctness check against XLA's conv
    ref = jax.lax.conv_general_dilated(
        x, w, window_strides=(1, 1), padding="VALID",
        dimension_numbers=("NCHW", "OIHW", "NCHW"),
    ) + b.reshape(1, COUT, 1, 1)
    assert out.shape == (N, COUT, H - 2, W - 2)
    assert jnp.max(jnp.abs(out - ref)) < 1e-3

    print("KERNEL_OK")
</pallas_src>

<mosaic_0001>
module attributes {stable_mosaic.version = 11 : i64} {
  func.func @_conv3x3_kernel(%arg0: i32, %arg1: memref<1x3x256xf32, #tpu.memory_space<vmem>>, %arg2: memref<64x28xf32, #tpu.memory_space<vmem>>, %arg3: memref<1x64x196xf32, #tpu.memory_space<vmem>>) attributes {dimension_semantics = [#tpu.dimension_semantics<parallel>], iteration_bounds = array<i64: 2>, scalar_prefetch = 0 : i64, scratch_operands = 0 : i64, tpu.core_type = #tpu.core_type<tc>, window_params = [{transform_indices = @transform_0, window_bounds = array<i64: 1, 3, 256>}, {pipeline_mode = #tpu.pipeline_mode<synchronous>, transform_indices = @transform_1, window_bounds = array<i64: 64, 28>}, {transform_indices = @transform_2, window_bounds = array<i64: 1, 64, 196>}]} {
    %c0 = arith.constant 0 : index
    %c0_0 = arith.constant 0 : index
    %c0_1 = arith.constant 0 : index
    %0 = vector.load %arg1[%c0, %c0_0, %c0_1] : memref<1x3x256xf32, #tpu.memory_space<vmem>>, vector<1x3x256xf32>
    %1 = vector.shape_cast %0 : vector<1x3x256xf32> to vector<3x256xf32>
    %2 = vector.extract_strided_slice %1 {offsets = [0, 0], sizes = [3, 222], strides = [1, 1]} : vector<3x256xf32> to vector<3x222xf32>
    %3 = vector.extract_strided_slice %1 {offsets = [0, 1], sizes = [3, 222], strides = [1, 1]} : vector<3x256xf32> to vector<3x222xf32>
    %4 = vector.extract_strided_slice %1 {offsets = [0, 2], sizes = [3, 222], strides = [1, 1]} : vector<3x256xf32> to vector<3x222xf32>
    %5 = vector.extract_strided_slice %1 {offsets = [0, 16], sizes = [3, 222], strides = [1, 1]} : vector<3x256xf32> to vector<3x222xf32>
    %6 = vector.extract_strided_slice %1 {offsets = [0, 17], sizes = [3, 222], strides = [1, 1]} : vector<3x256xf32> to vector<3x222xf32>
    %7 = vector.extract_strided_slice %1 {offsets = [0, 18], sizes = [3, 222], strides = [1, 1]} : vector<3x256xf32> to vector<3x222xf32>
    %8 = vector.extract_strided_slice %1 {offsets = [0, 32], sizes = [3, 222], strides = [1, 1]} : vector<3x256xf32> to vector<3x222xf32>
    %9 = vector.extract_strided_slice %1 {offsets = [0, 33], sizes = [3, 222], strides = [1, 1]} : vector<3x256xf32> to vector<3x222xf32>
    %10 = vector.extract_strided_slice %1 {offsets = [0, 34], sizes = [3, 222], strides = [1, 1]} : vector<3x256xf32> to vector<3x222xf32>
    %11 = tpu.concatenate %2, %3, %4, %5, %6, %7, %8, %9, %10 in 0 : vector<3x222xf32>, vector<3x222xf32>, vector<3x222xf32>, vector<3x222xf32>, vector<3x222xf32>, vector<3x222xf32>, vector<3x222xf32>, vector<3x222xf32>, vector<3x222xf32> -> vector<27x222xf32>
    %12 = vector.extract_strided_slice %11 {offsets = [0, 0], sizes = [27, 14], strides = [1, 1]} : vector<27x222xf32> to vector<27x14xf32>
    %13 = vector.extract_strided_slice %11 {offsets = [0, 16], sizes = [27, 14], strides = [1, 1]} : vector<27x222xf32> to vector<27x14xf32>
    %14 = vector.extract_strided_slice %11 {offsets = [0, 32], sizes = [27, 14], strides = [1, 1]} : vector<27x222xf32> to vector<27x14xf32>
    %15 = vector.extract_strided_slice %11 {offsets = [0, 48], sizes = [27, 14], strides = [1, 1]} : vector<27x222xf32> to vector<27x14xf32>
    %16 = vector.extract_strided_slice %11 {offsets = [0, 64], sizes = [27, 14], strides = [1, 1]} : vector<27x222xf32> to vector<27x14xf32>
    %17 = vector.extract_strided_slice %11 {offsets = [0, 80], sizes = [27, 14], strides = [1, 1]} : vector<27x222xf32> to vector<27x14xf32>
    %18 = vector.extract_strided_slice %11 {offsets = [0, 96], sizes = [27, 14], strides = [1, 1]} : vector<27x222xf32> to vector<27x14xf32>
    %19 = vector.extract_strided_slice %11 {offsets = [0, 112], sizes = [27, 14], strides = [1, 1]} : vector<27x222xf32> to vector<27x14xf32>
    %20 = vector.extract_strided_slice %11 {offsets = [0, 128], sizes = [27, 14], strides = [1, 1]} : vector<27x222xf32> to vector<27x14xf32>
    %21 = vector.extract_strided_slice %11 {offsets = [0, 144], sizes = [27, 14], strides = [1, 1]} : vector<27x222xf32> to vector<27x14xf32>
    %22 = vector.extract_strided_slice %11 {offsets = [0, 160], sizes = [27, 14], strides = [1, 1]} : vector<27x222xf32> to vector<27x14xf32>
    %23 = vector.extract_strided_slice %11 {offsets = [0, 176], sizes = [27, 14], strides = [1, 1]} : vector<27x222xf32> to vector<27x14xf32>
    %24 = vector.extract_strided_slice %11 {offsets = [0, 192], sizes = [27, 14], strides = [1, 1]} : vector<27x222xf32> to vector<27x14xf32>
    %25 = vector.extract_strided_slice %11 {offsets = [0, 208], sizes = [27, 14], strides = [1, 1]} : vector<27x222xf32> to vector<27x14xf32>
    %26 = tpu.concatenate %12, %13, %14, %15, %16, %17, %18, %19, %20, %21, %22, %23, %24, %25 in 1 : vector<27x14xf32>, vector<27x14xf32>, vector<27x14xf32>, vector<27x14xf32>, vector<27x14xf32>, vector<27x14xf32>, vector<27x14xf32>, vector<27x14xf32>, vector<27x14xf32>, vector<27x14xf32>, vector<27x14xf32>, vector<27x14xf32>, vector<27x14xf32>, vector<27x14xf32> -> vector<27x196xf32>
    %cst = arith.constant 1.000000e+00 : f32
    %27 = vector.broadcast %cst : f32 to vector<1x196xf32>
    %28 = tpu.concatenate %26, %27 in 0 : vector<27x196xf32>, vector<1x196xf32> -> vector<28x196xf32>
    %c0_2 = arith.constant 0 : index
    %c0_3 = arith.constant 0 : index
    %29 = vector.load %arg2[%c0_2, %c0_3] : memref<64x28xf32, #tpu.memory_space<vmem>>, vector<64x28xf32>
    %cst_4 = arith.constant dense<0.000000e+00> : vector<64x196xf32>
    %30 = tpu.matmul %29, %28, %cst_4 {dimension_numbers = #tpu.dot_dimension_numbers<[1], [0], [0], [1], [0, 0, 1, 1], [], []>} : vector<64x28xf32>, vector<28x196xf32>, vector<64x196xf32> -> vector<64x196xf32>
    %c0_5 = arith.constant 0 : index
    %c0_6 = arith.constant 0 : index
    %c0_7 = arith.constant 0 : index
    %31 = vector.load %arg3[%c0_5, %c0_6, %c0_7] : memref<1x64x196xf32, #tpu.memory_space<vmem>>, vector<1x64x196xf32>
    %32 = vector.shape_cast %31 : vector<1x64x196xf32> to vector<64x196xf32>
    %33 = vector.shape_cast %30 : vector<64x196xf32> to vector<1x64x196xf32>
    tpu.vector_store %arg3[%c0_5, %c0_6, %c0_7], %33 {strides = array<i32>} : memref<1x64x196xf32, #tpu.memory_space<vmem>>, vector<1x64x196xf32>,
    return
  }
  func.func @transform_0(%arg0: i32) -> (i32, i32, i32) {
    %c0_i32 = arith.constant 0 : i32
    %c0_i32_0 = arith.constant 0 : i32
    %c0_i32_1 = arith.constant 0 : i32
    return %arg0, %c0_i32, %c0_i32_0 : i32, i32, i32
  }
  func.func @transform_1(%arg0: i32) -> (i32, i32) {
    %c0_i32 = arith.constant 0 : i32
    %c0_i32_0 = arith.constant 0 : i32
    %c0_i32_1 = arith.constant 0 : i32
    return %c0_i32, %c0_i32_0 : i32, i32
  }
  func.func @transform_2(%arg0: i32) -> (i32, i32, i32) {
    %c0_i32 = arith.constant 0 : i32
    %c0_i32_0 = arith.constant 0 : i32
    %c0_i32_1 = arith.constant 0 : i32
    return %arg0, %c0_i32, %c0_i32_0 : i32, i32, i32
  }
}

</mosaic_0001>

<bundles_post_ra>
// kernel: tpu_custom_call.1
= control target key start
LH: loop header
LB: loop body
LE: loop exit
PB: predicated region body
PF: predicated region fallthrough
CT: control target
= control target key end

     0   :  { %7 = vsyncpa [#allocation3], 0  ;;  %s1465_s0 = inlined_call_operand.vmem [shape: f32[2,3,256], index: 0, kind: input, shape index: {}]   ;;  %s1466_s1 = inlined_call_operand.vmem [shape: f32[64,28], index: 1, kind: input, shape index: {}]   ;;  %s1467_s2 = inlined_call_operand.hbm [shape: f32[2,64,196], index: 2, kind: output, shape index: {}]  }
   0x1   :  { %9 = vsyncpa [#allocation3 + $0x1], 0  ;;  %s1087_s9 = smov 0   ;;  %s1089_s10 = smov 0  }
   0x2   :  { %s1091_s11 = smov 0   ;;  %s1093_s12 = smov 0  }
   0x3 LB: > { %s1108_s13 = sadd.s32 4294967295, %s1047_s12   ;;  %s714_s14 = sadd.s32 4294967294, %s1047_s12   ;;  %s1047_s12 = sphi %s1093_s12, %s1473_s12   ;;  %s1043_s11 = sphi %s1091_s11, %s1472_s11   ;;  %s1039_s10 = sphi %s1089_s10, %s1471_s10   ;;  %s1035_s9 = sphi %s1087_s9, %s1470_s9  }
   0x4   : > { %s1112_s15 = sadd.s32 1, %s1047_s12   ;;  %s69_s16 = sadd.s32 1, %s1043_s11 }
   0x5   : > { %s66_s17 = ssub.s32 %s1047_s12, %s1112_s15  ;;  %p79_p0 = scmp.ne.s32.totalorder %s1043_s11, %s1039_s10 }
   0x6   : > { %p67_p1 = scmp.eq.s32.totalorder %s66_s17, 0  ;;  %p80_p2 = scmp.eq.s32.totalorder %s1108_s13, 1 }
   0x7   : > { %p85_p3 = scmp.ne.s32.totalorder %s1039_s10, %s1035_s9  ;;  %p86_p4 = scmp.eq.s32.totalorder %s714_s14, 1 }
   0x8   : > { %s1123_s18 = scalar_select %p67_p1, %s1043_s11, %s69_s16  }
   0x9   : > { %p1125_p5 = por %p80_p2, %p79_p0  ;;  %p1129_p6 = por %p86_p4, %p85_p3 }
   0xa   : > { %p717_p7 = scmp.ge.s32.totalorder %s1047_s12, 1  ;;  %p115_p8 = scmp.lt.s32.totalorder %s1047_s12, 3 }
   0xc   : > { %p116_p9 = pnand %p717_p7, %p115_p8 }
   0xd   : > { %p137_p10 = scmp.lt.s32.totalorder (!%p116_p9), %s1108_s13, 1  ;;  %s1049_s26 = smov (!%p116_p9), 111   ;;  %vm222_vm0 = vcmask (!%p116_p9), 1042432   ;;  %vm228_vm1 = vcmask (!%p116_p9), 1040384   ;;  %vm191_vm2 = vcmask (!%p116_p9), 900096   ;;  %vm231_vm3 = vcmask (!%p116_p9), 1043456  }
   0xe   : > { %119 = sbr.rel (%p116_p9) target bundleno = 579 (0x243), region = 28  ;;  %s1050_s27 = smov (!%p116_p9), 126   ;;  %vm237_vm4 = vcmask (!%p116_p9), 1041408   ;;  %vm234_vm5 = vcmask (!%p116_p9), 1046528   ;;  %vm240_vm6 = vcmask (!%p116_p9), 1044480   ;;  %vm201_vm7 = vcmask (!%p116_p9), 785408  }
   0xf   : > { %s1051_s28 = smov (!%p116_p9), 127   ;;  %s1052_s29 = smov (!%p116_p9), 112   ;;  %vm225_vm8 = vcmask (!%p116_p9), 1045504   ;;  %vm211_vm9 = vcmask (!%p116_p9), 777216   ;;  %vm219_vm10 = vcmask (!%p116_p9), 769024   ;;  %vm172_vm11 = vcmask (!%p116_p9), 916480  }
  0x10   : > { %s1053_s30 = smov (!%p116_p9), 96   ;;  %s1054_s3 = smov (!%p116_p9), 110   ;;  %vm162_vm12 = vcmask (!%p116_p9), 1031168   ;;  %vm152_vm13 = vcmask (!%p116_p9), 1039360   ;;  %vm181_vm14 = vcmask (!%p116_p9), 908288   ;;  %vm448_vm15 = vcmask (!%p116_p9), 97280  }
  0x11   : > { %s1055_s4 = smov (!%p116_p9), 94   ;;  %s1056_s5 = smov (!%p116_p9), 95  }
  0x12   : > { %s1057_s6 = smov (!%p116_p9), 108   ;;  %s1058_s7 = smov (!%p116_p9), 106  }
  0x13   : > { %s1059_s8 = smov (!%p116_p9), 120   ;;  %s1060_s14 = smov (!%p116_p9), 124  }
  0x14   : > { %s1061_s16 = smov (!%p116_p9), 104   ;;  %s1062_s17 = smov (!%p116_p9), 116  }
  0x15   : > { %s138_s21 = scalar_select %p137_p10, %s1108_s13, 1 }
  0x16   : > { %s1065_s23 = smov 102   ;;  %s1066_s24 = smov 114  }
  0x17   : > { %s736_s22 = sshll.u32 %s138_s21, 3  ;;  %s1063_s21 = smov 122  }
  0x18   : > { %s141_s25 = scalar_lea.vmem %s1465_s0, %s736_s22  ;;  %s1064_s22 = smov 118  }
  0x19   : > { %v1140_v0 = vld [vmem:[%s141_s25] sm:$0x77]  ;;  %s737_s25 = sshll.u32 %s1108_s13, 11 }
  0x1a   : > { %v176_v1 = vcombine.low %v1140_v0, %v1140_v0  ;;  %v1146_v2 = vcombine.high %v1140_v0, %v1140_v0  ;;  %v156_v3 = vrot.slane %v1140_v0, 2  ;;  %v146_v4 = vrot.slane %v1140_v0, 5 }
  0x1b   : > { %v166_v5 = vrot.slane %v1140_v0, 7  ;;  %v195_v12 = vrot.slane %v1140_v0, 6  ;;  %v185_v15 = vrot.slane %v1140_v0, 1  ;;  %v205_v19 = vrot.slane %v1140_v0, 3 }
  0x1c   : > { %v813_v6 = vpack.i.bf16 %v1140_v0, %v176_v1  ;;  %v157_v7 = vrot.slane %v1146_v2, 2  ;;  %v147_v8 = vrot.slane %v1146_v2, 5  ;;  %v167_v9 = vrot.slane %v1146_v2, 7 }
  0x1d   : > { %v196_v13 = vrot.slane %v1146_v2, 6  ;;  %v186_v16 = vrot.slane %v1146_v2, 1  ;;  %v206_v20 = vrot.slane %v1146_v2, 3  ;;  %v848_v21 = vpack.i.bf16 %v1146_v2, %v1140_v0 }
  0x1e   : > { %814 = vrot.lane.b32.xlu1 %v813_v6, %s1049_s26  ;;  %v818_v10 = vpack.i.bf16 %v157_v7, %v156_v3  ;;  %v828_v11 = vpack.i.bf16 %v147_v8, %v146_v4  ;;  %v823_v14 = vpack.i.bf16 %v167_v9, %v166_v5 }
  0x1f   : > { %v838_v17 = vpack.i.bf16 %v196_v13, %v195_v12  ;;  %v833_v18 = vpack.i.bf16 %v186_v16, %v185_v15  ;;  %v843_v22 = vpack.i.bf16 %v206_v20, %v205_v19 }
  0x20   : > { %819 = vrot.lane.b32.xlu0 %v818_v10, %s1050_s27 }
  0x22   : > { %829 = vrot.lane.b32.xlu1 %v828_v11, %s1051_s28 }
  0x24   : > { %824 = vrot.lane.b32.xlu0 %v823_v14, %s1052_s29 }
  0x26   : > { %839 = vrot.lane.b32.xlu1 %v838_v17, %s1053_s30 }
  0x28   : > { %834 = vrot.lane.b32.xlu0 %v833_v18, %s1054_s3 }
  0x2a   : > { %849 = vrot.lane.b32.xlu1 %v848_v21, %s1055_s4 }
  0x2c   : > { %844 = vrot.lane.b32.xlu0 %v843_v22, %s1056_s5 }
  0x90   : > { %v1166_v23 = vpop.permute.xlu1 %814 }
  0x91   : > { %v817_v41 = vunpack.i.h.bf16 %v1166_v23  ;;  %v816_v63 = vunpack.i.l.bf16 %v1166_v23 }
  0x92   : > { %v1168_v24 = vpop.permute.xlu0 %819 }
  0x93   : > { %v822_v33 = vunpack.i.h.bf16 %v1168_v24  ;;  %v821_v60 = vunpack.i.l.bf16 %v1168_v24  ;;  %v182_v4 = vsel %vm181_vm14, %v816_v63, %v817_v41  ;;  %vm1068_vm14 = vmmov 1  }
  0x94   : > { %v1170_v25 = vpop.permute.xlu1 %829 }
  0x95   : > { %v832_v34 = vunpack.i.h.bf16 %v1170_v25  ;;  %v831_v61 = vunpack.i.l.bf16 %v1170_v25  ;;  %v163_v1 = vsel %vm162_vm12, %v821_v60, %v822_v33 }
  0x96   : > { %v825_v26 = vpop.permute.xlu0 %824 }
  0x97   : > { %v827_v29 = vunpack.i.h.bf16 %v825_v26  ;;  %v224_v45 = vsel %vm222_vm0, %v1146_v2, %v832_v34  ;;  %v826_v59 = vunpack.i.l.bf16 %v825_v26  ;;  %v153_v2 = vsel %vm152_vm13, %v831_v61, %v832_v34 }
  0x98   : > { %v840_v27 = vpop.permute.xlu1 %839  ;;  %v227_v53 = vsel %vm225_vm8, %v224_v45, %v822_v33  ;;  %v223_v5 = vsel %vm222_vm0, %v1140_v0, %v153_v2  ;;  %v1067_v0 = vmov 0.0   ;;  %vm435_vm13 = vcmask 801792  }
  0x99   : > { %v842_v31 = vunpack.i.h.bf16 %v840_v27  ;;  %v230_v37 = vsel %vm228_vm1, %v822_v33, %v827_v29  ;;  %v841_v39 = vunpack.i.l.bf16 %v840_v27  ;;  %v173_v62 = vsel %vm172_vm11, %v826_v59, %v827_v29  ;;  %572 = vmatprep.mubr.f32.mxu0 %v1067_v0  ;;  %596 = vmatprep.mubr.f32.mxu1 %v1067_v0 }
  0x9a   : > { %v835_v28 = vpop.permute.xlu0 %834  ;;  %v233_v46 = vsel %vm231_vm3, %v230_v37, %v817_v41  ;;  %v229_v3 = vsel %vm228_vm1, %v163_v1, %v173_v62  ;;  %v1216_v8 = vsel %vm225_vm8, %v223_v5, %v163_v1  ;;  %vm453_vm1 = vcmask 211968  }
  0x9b   : > { %v837_v30 = vunpack.i.h.bf16 %v835_v28  ;;  %v836_v38 = vunpack.i.l.bf16 %v835_v28  ;;  %v202_v50 = vsel %vm201_vm7, %v841_v39, %v842_v31  ;;  %v232_v6 = vsel %vm231_vm3, %v229_v3, %v182_v4 }
  0x9c   : > { %v850_v32 = vpop.permute.xlu1 %849  ;;  %vm463_vm7 = vcmask 441344   ;;  %vm420_vm8 = vcmask 457728  }
  0x9d   : > { %v852_v36 = vunpack.i.h.bf16 %v850_v32  ;;  %v239_v42 = vsel %vm237_vm4, %v837_v30, %v842_v31  ;;  %v192_v48 = vsel %vm191_vm2, %v836_v38, %v837_v30  ;;  %v236_v49 = vsel %vm234_vm5, %v233_v46, %v837_v30 }
  0x9e   : > { %v845_v35 = vpop.permute.xlu0 %844  ;;  %v851_v51 = vunpack.i.l.bf16 %v850_v32  ;;  %v238_v54 = vsel %vm237_vm4, %v192_v48, %v202_v50  ;;  %v883_v55 = vpack.i.bf16 %v236_v49, %v227_v53  ;;  %v1213_v7 = vsel %vm234_vm5, %v232_v6, %v192_v48 }
  0x9f   : > { %v847_v40 = vunpack.i.h.bf16 %v845_v35  ;;  %v846_v43 = vunpack.i.l.bf16 %v845_v35  ;;  %v928_v9 = vpack.i.bf16 %v1213_v7, %v1216_v8  ;;  %vm405_vm2 = vcmask 113664  }
  0xa0   : > { %v1193_v57 = vsel %vm219_vm10, %v851_v51, %v852_v36  ;;  %vm410_vm4 = vcmask 228352   ;;  %vm415_vm5 = vcmask 343040   ;;  %vm430_vm10 = vcmask 687104  }
  0xa1   : > { %v242_v44 = vsel %vm240_vm6, %v239_v42, %v847_v40  ;;  %v212_v52 = vsel %vm211_vm9, %v846_v43, %v847_v40  ;;  %vm425_vm9 = vcmask 572416  }
  0xa2   : > { %v1181_v47 = vpack.i.bf16 %v242_v44, %v852_v36  ;;  %v1191_v56 = vsel %vm240_vm6, %v238_v54, %v212_v52  ;;  %vm458_vm6 = vcmask 326656  }
  0xa3   : > { %v868_v58 = vpack.i.bf16 %v1191_v56, %v1193_v57 }
  0xa4   : > { %859 = vrot.lane.b32.xlu0 %v1181_v47, %s1057_s6  ;;  %854 = vrot.lane.b32.xlu1 %v1181_v47, %s1054_s3 }
  0xa8   : > { %864 = vrot.lane.b32.xlu1 %v1181_v47, %s1058_s7  ;;  %884 = vrot.lane.b32.xlu0 %v883_v55, %s1057_s6 }
  0xac   : > { %869 = vrot.lane.b32.xlu1 %v868_v58, %s1050_s27  ;;  %899 = vrot.lane.b32.xlu0 %v868_v58, %s1059_s8 }
  0xb0   : > { %874 = vrot.lane.b32.xlu1 %v868_v58, %s1060_s14  ;;  %904 = vrot.lane.b32.xlu0 %v883_v55, %s1061_s16 }
  0xb4   : > { %914 = vrot.lane.b32.xlu0 %v883_v55, %s1052_s29  ;;  %879 = vrot.lane.b32.xlu1 %v883_v55, %s1054_s3  ;;  %s1069_s3 = smov [#allocation2]  }
  0xb5   : > { %s989_s4 = sshll.u32 %s1069_s3, 4  ;;  %s990_s4 = int_to_ptr.vmem [resolvable:$false] %s989_s4 }
  0xb6   : > { %s991_s5 = scalar_lea.vmem %s990_s4, 4096 }
  0xb8   : > { %924 = vrot.lane.b32.xlu0 %v868_v58, %s1062_s17  ;;  %889 = vrot.lane.b32.xlu1 %v868_v58, %s1063_s21 }
  0xbc   : > { %894 = vrot.lane.b32.xlu1 %v883_v55, %s1058_s7  ;;  %929 = vrot.lane.b32.xlu0 %v928_v9, %s1050_s27 }
  0xc0   : > { %909 = vrot.lane.b32.xlu1 %v868_v58, %s1064_s22  ;;  %939 = vrot.lane.b32.xlu0 %v928_v9, %s1063_s21 }
  0xc4   : > { %919 = vrot.lane.b32.xlu1 %v883_v55, %s1065_s23  ;;  %944 = vrot.lane.b32.xlu0 %v928_v9, %s1059_s8 }
  0xc8   : > { %934 = vrot.lane.b32.xlu1 %v928_v9, %s1060_s14  ;;  %949 = vrot.lane.b32.xlu0 %v928_v9, %s1064_s22  ;;  %s134_s22 = sand.u32 1, %s1039_s10  }
  0xc9   : > { %s1424_s13 = scalar_lea.sflag [#allocation3], %s134_s22 }
  0xcc   : > { %964 = vrot.lane.b32.xlu1 %v1181_v47, %s1061_s16  ;;  %954 = vrot.lane.b32.xlu0 %v928_v9, %s1062_s17 }
  0xd0   : > { %969 = vrot.lane.b32.xlu1 %v928_v9, %s1066_s24  ;;  %959 = vrot.lane.b32.xlu0 %v868_v58, %s1066_s24 }
  0xd4   : > { %979 = vrot.lane.b32.xlu1 %v1181_v47, %s1065_s23  ;;  %974 = vrot.lane.b32.xlu0 %v1181_v47, %s1052_s29  ;;  %s718_s23 = sshll.u32 %s134_s22, 7  ;;  %s1412_s29 = scalar_lea.hbm %s1467_s2, %s737_s25 }
  0xd5   : > { %s1387_s24 = scalar_lea.vmem [#allocation2], %s718_s23 }
  0xd6   : > { %s652_s26 = sshll.u32 %s1387_s24, 4  ;;  %s1414_s26 = int_to_ptr.vmem [resolvable:$true] %s652_s26 }
  0xd7   : > { %s985_s30 = scalar_lea.vmem %s1414_s26, 2048  ;;  %p992_p0 = scmp.lt.s32.totalorder %s1414_s26, %s990_s4 }
  0xd8   : > { %p986_p11 = scmp.ne.s32.totalorder %s1414_s26, %s985_s30  ;;  %p993_p1 = scmp.lt.s32.totalorder %s991_s5, %s985_s30 }
  0xda   : > { %p987_p12 = pnand %p986_p11, %p1125_p5  ;;  %p994_p2 = por %p993_p1, %p992_p0 }
  0xdc   : > { %p988_p13 = pneg %p987_p12 }
  0xde   : > { %p995_p3 = pnand %p994_p2, %p988_p13 }
 0x116   : > { %v860_v10 = vpop.permute.xlu0 %859  ;;  %v1229_v11 = vpop.permute.xlu1 %854 }
 0x117   : > { %v862_v22 = vunpack.i.h.bf16 %v860_v10  ;;  %v857_v23 = vunpack.i.h.bf16 %v1229_v11  ;;  %v861_v26 = vunpack.i.l.bf16 %v860_v10  ;;  %v856_v27 = vunpack.i.l.bf16 %v1229_v11  ;;  %v470_v11 = vld [vmem:[%s1466_s1] sm:$0xff] }
 0x119   : > { %v451_v34 = vsel %vm448_vm15, %v857_v23, %v862_v22  ;;  %v452_v39 = vsel %vm448_vm15, %v856_v27, %v861_v26 }
 0x11a   : > { %v865_v12 = vpop.permute.xlu1 %864  ;;  %v885_v13 = vpop.permute.xlu0 %884 }
 0x11b   : > { %v867_v28 = vunpack.i.h.bf16 %v865_v12  ;;  %v866_v29 = vunpack.i.l.bf16 %v865_v12  ;;  %v887_v35 = vunpack.i.h.bf16 %v885_v13  ;;  %v886_v36 = vunpack.i.l.bf16 %v885_v13 }
 0x11d   : > { %v1258_v40 = vsel %vm453_vm1, %v451_v34, %v867_v28  ;;  %v1261_v41 = vsel %vm453_vm1, %v452_v39, %v866_v29 }
 0x11e   : > { %v870_v14 = vpop.permute.xlu1 %869  ;;  %v1231_v15 = vpop.permute.xlu0 %899 }
 0x11f   : > { %v872_v42 = vunpack.i.h.bf16 %v870_v14  ;;  %v871_v45 = vunpack.i.l.bf16 %v870_v14  ;;  %v902_v46 = vunpack.i.h.bf16 %v1231_v15  ;;  %v901_v6 = vunpack.i.l.bf16 %v1231_v15 }
 0x121   : > { %v408_v2 = vsel %vm405_vm2, %v1191_v56, %v872_v42  ;;  %v409_v3 = vsel %vm405_vm2, %v1193_v57, %v871_v45 }
 0x122   : > { %v1233_v16 = vpop.permute.xlu1 %874  ;;  %v905_v17 = vpop.permute.xlu0 %904 }
 0x123   : > { %v877_v49 = vunpack.i.h.bf16 %v1233_v16  ;;  %v876_v50 = vunpack.i.l.bf16 %v1233_v16  ;;  %v907_v51 = vunpack.i.h.bf16 %v905_v17  ;;  %v906_v52 = vunpack.i.l.bf16 %v905_v17 }
 0x125   : > { %v413_v9 = vsel %vm410_vm4, %v408_v2, %v877_v49  ;;  %v414_v10 = vsel %vm410_vm4, %v409_v3, %v876_v50 }
 0x126   : > { %v1235_v18 = vpop.permute.xlu0 %914  ;;  %v1237_v19 = vpop.permute.xlu1 %879 }
 0x127   : > { %v882_v30 = vunpack.i.h.bf16 %v1237_v19  ;;  %v881_v31 = vunpack.i.l.bf16 %v1237_v19 }
 0x129   : > { %v450_v43 = vsel %vm448_vm15, %v882_v30, %v887_v35  ;;  %v449_v44 = vsel %vm448_vm15, %v881_v31, %v886_v36  ;;  %vm743_vm15 = vmpackc.low %vm231_vm3, %vm1068_vm14 }
 0x12a   : > { %v1239_v20 = vpop.permute.xlu0 %924  ;;  %v1241_v21 = vpop.permute.xlu1 %889 }
 0x12b   : > { %v892_v55 = vunpack.i.h.bf16 %v1241_v21  ;;  %v891_v58 = vunpack.i.l.bf16 %v1241_v21 }
 0x12d   : > { %v418_v56 = vsel %vm415_vm5, %v413_v9, %v892_v55  ;;  %v419_v16 = vsel %vm415_vm5, %v414_v10, %v891_v58 }
 0x12e   : > { %v895_v24 = vpop.permute.xlu1 %894  ;;  %v1244_v25 = vpop.permute.xlu0 %929 }
 0x12f   : > { %v897_v32 = vunpack.i.h.bf16 %v895_v24  ;;  %v896_v33 = vunpack.i.l.bf16 %v895_v24  ;;  %v932_v61 = vunpack.i.h.bf16 %v1244_v25  ;;  %v931_v62 = vunpack.i.l.bf16 %v1244_v25 }
 0x131   : > { %v454_v47 = vsel %vm453_vm1, %v449_v44, %v896_v33  ;;  %v455_v48 = vsel %vm453_vm1, %v450_v43, %v897_v32  ;;  %v407_v21 = vsel %vm405_vm2, %v1213_v7, %v932_v61  ;;  %v406_v15 = vsel %vm405_vm2, %v1216_v8, %v931_v62 }
 0x132   : > { %v1252_v37 = vpop.permute.xlu1 %909  ;;  %v940_v38 = vpop.permute.xlu0 %939  ;;  %v459_v63 = vsel %vm458_vm6, %v454_v47, %v906_v52  ;;  %v460_v1 = vsel %vm458_vm6, %v455_v48, %v907_v51  ;;  %v917_v43 = vunpack.i.h.bf16 %v1235_v18  ;;  %v916_v44 = vunpack.i.l.bf16 %v1235_v18 }
 0x133   : > { %v942_v22 = vunpack.i.h.bf16 %v940_v38  ;;  %v941_v24 = vunpack.i.l.bf16 %v940_v38  ;;  %v912_v32 = vunpack.i.h.bf16 %v1252_v37  ;;  %v911_v33 = vunpack.i.l.bf16 %v1252_v37 }
 0x134   : > { %v423_v37 = vsel %vm420_vm8, %v418_v56, %v902_v46  ;;  %v424_v48 = vsel %vm420_vm8, %v419_v16, %v901_v6  ;;  %v927_v18 = vunpack.i.h.bf16 %v1239_v20 }
 0x135   : > { %v428_v51 = vsel %vm425_vm9, %v423_v37, %v912_v32  ;;  %v429_v52 = vsel %vm425_vm9, %v424_v48, %v911_v33  ;;  %v475_v33 = vld [vmem:[%s1466_s1 + $0x28] sm:$0xff] }
 0x136   : > { %v920_v53 = vpop.permute.xlu1 %919  ;;  %v945_v54 = vpop.permute.xlu0 %944 }
 0x137   : > { %v922_v59 = vunpack.i.h.bf16 %v920_v53  ;;  %v921_v60 = vunpack.i.l.bf16 %v920_v53  ;;  %v947_v25 = vunpack.i.h.bf16 %v945_v54  ;;  %v946_v26 = vunpack.i.l.bf16 %v945_v54 }
 0x139   : > { %v464_v4 = vsel %vm463_vm7, %v459_v63, %v921_v60  ;;  %v465_v5 = vsel %vm463_vm7, %v460_v1, %v922_v59  ;;  %v926_v59 = vunpack.i.l.bf16 %v1239_v20 }
 0x13a   : > { %v935_v12 = vpop.permute.xlu1 %934  ;;  %v950_v13 = vpop.permute.xlu0 %949  ;;  %v738_v14 = vpack.c.bf16 %v465_v5, %v464_v4  ;;  %v433_v4 = vsel %vm430_vm10, %v428_v51, %v927_v18 }
 0x13b   : > { %v937_v57 = vunpack.i.h.bf16 %v935_v12  ;;  %v936_v17 = vunpack.i.l.bf16 %v935_v12  ;;  %v952_v36 = vunpack.i.h.bf16 %v950_v13  ;;  %v951_v38 = vunpack.i.l.bf16 %v950_v13 }
 0x13c   : > { %739 = vmatprep.subr.bf16.mxu0 %v738_v14  ;;  %748 = vmatprep.subr.bf16.mxu1 %v738_v14  ;;  %v434_v5 = vsel %vm430_vm10, %v429_v52, %v926_v59 }
 0x13d   : > { %v411_v28 = vsel %vm410_vm4, %v406_v15, %v936_v17  ;;  %v412_v29 = vsel %vm410_vm4, %v407_v21, %v937_v57 }
 0x13e   : > { %v416_v34 = vsel %vm415_vm5, %v411_v28, %v941_v24  ;;  %v417_v7 = vsel %vm415_vm5, %v412_v29, %v942_v22  ;;  %v965_v35 = vpop.permute.xlu1 %964  ;;  %v955_v8 = vpop.permute.xlu0 %954 }
 0x13f   : > { %v421_v39 = vsel %vm420_vm8, %v416_v34, %v946_v26  ;;  %v422_v42 = vsel %vm420_vm8, %v417_v7, %v947_v25  ;;  %v957_v45 = vunpack.i.h.bf16 %v955_v8  ;;  %v956_v47 = vunpack.i.l.bf16 %v955_v8  ;;  %v472_v34 = vld [vmem:[%s1466_s1 + $0x10] sm:$0xff]  ;;  %v477_v8 = vld [vmem:[%s1466_s1 + $0x38] sm:$0xff] }
 0x140   : > { %v426_v49 = vsel %vm425_vm9, %v421_v39, %v951_v38  ;;  %v427_v50 = vsel %vm425_vm9, %v422_v42, %v952_v36  ;;  %v967_v53 = vunpack.i.h.bf16 %v965_v35  ;;  %v966_v54 = vunpack.i.l.bf16 %v965_v35  ;;  %v476_v7 = vld [vmem:[%s1466_s1 + $0x30] sm:$0xff]  ;;  %v473_v35 = vld [vmem:[%s1466_s1 + $0x18] sm:$0xff] }
 0x141   : > { %v431_v61 = vsel %vm430_vm10, %v426_v49, %v956_v47  ;;  %v432_v62 = vsel %vm430_vm10, %v427_v50, %v957_v45 }
 0x142   : > { %v970_v55 = vpop.permute.xlu1 %969  ;;  %v960_v58 = vpop.permute.xlu0 %959  ;;  %v461_v6 = vsel %vm458_vm6, %v1258_v40, %v967_v53  ;;  %v462_v20 = vsel %vm458_vm6, %v1261_v41, %v966_v54 }
 0x143   : > { %v972_v60 = vunpack.i.h.bf16 %v970_v55  ;;  %v971_v46 = vunpack.i.l.bf16 %v970_v55  ;;  %v962_v63 = vunpack.i.h.bf16 %v960_v58  ;;  %v961_v1 = vunpack.i.l.bf16 %v960_v58 }
 0x145   : > { %v436_v2 = vsel %vm435_vm13, %v431_v61, %v971_v46  ;;  %v437_v3 = vsel %vm435_vm13, %v432_v62, %v972_v60  ;;  %v438_v17 = vsel %vm435_vm13, %v433_v4, %v962_v63  ;;  %v439_v21 = vsel %vm435_vm13, %v434_v5, %v961_v1 }
 0x146   : > { %v980_v9 = vpop.permute.xlu1 %979  ;;  %v975_v10 = vpop.permute.xlu0 %974  ;;  %v440_v12 = vsel %vm172_vm11, %v436_v2, %v916_v44  ;;  %v441_v13 = vsel %vm172_vm11, %v437_v3, %v917_v43 }
 0x147   : > { %v982_v14 = vunpack.i.h.bf16 %v980_v9  ;;  %v981_v56 = vunpack.i.l.bf16 %v980_v9  ;;  %v977_v16 = vunpack.i.h.bf16 %v975_v10  ;;  %v976_v57 = vunpack.i.l.bf16 %v975_v10 }
 0x148   : > { %v444_v40 = vsel %vm162_vm12, %v440_v12, %v881_v31  ;;  %v445_v41 = vsel %vm162_vm12, %v441_v13, %v882_v30 }
 0x149   : > { %v466_v15 = vsel %vm463_vm7, %v461_v6, %v982_v14  ;;  %v467_v22 = vsel %vm463_vm7, %v462_v20, %v981_v56  ;;  %v442_v24 = vsel %vm172_vm11, %v438_v17, %v977_v16  ;;  %v443_v25 = vsel %vm172_vm11, %v439_v21, %v976_v57 }
 0x14a   : > { %v469_v26 = vsel %vm222_vm0, %v467_v22, 1.0  ;;  %v446_v28 = vsel %vm162_vm12, %v442_v24, %v857_v23  ;;  %v447_v19 = vsel %vm162_vm12, %v443_v25, %v856_v27  ;;  %v740_v31 = vpack.c.bf16 %v445_v41, %v444_v40  ;;  %v474_v23 = vld [vmem:[%s1466_s1 + $0x20] sm:$0xff]  ;;  %v471_v27 = vld [vmem:[%s1466_s1 + $0x8] sm:$0xff] }
 0x14b   : > { %v742_v30 = vpack.c.bf16 %v469_v26, %v466_v15  ;;  %v468_v29 = vsel %vm222_vm0, %v447_v19, 1.0  ;;  %vm622_vm0 = vcmask 556032  }
 0x14c   : > { %741 = vmatpush1.bf16.msra.mxu0 %v740_v31  ;;  %750 = vmatpush1.bf16.msra.mxu1 %v740_v31  ;;  %v745_v32 = vpack.c.bf16 %v468_v29, %v446_v28 }
 0x14d   : > { %744 = vmatprep.subr.msk.bf16.mxu0 %vm743_vm15, %v742_v30  ;;  %749 = vmatprep.subr.msk.bf16.mxu1 %vm743_vm15, %v742_v30 }
 0x150   : > { %747 = vmatpush1.bf16.msk.msra.mxu0 %vm743_vm15, %v745_v32  ;;  %751 = vmatpush1.bf16.msk.msra.mxu1 %vm743_vm15, %v745_v32 }
 0x153   : > { %723 = vmatmul.mubr.msk.f32.vlgmr.msra.gmra.mrb[0].mxu0 %vm410_vm4, %v470_v11  ;;  %727 = vmatmul.mubr.msk.f32.vlgmr.msra.gmra.mrb[0].mxu1 %vm410_vm4, %v474_v23 }
 0x154   : > { %578 = vmatprep.mubr.f32.mxu0 %v1067_v0  ;;  %602 = vmatprep.mubr.f32.mxu1 %v1067_v0 }
 0x157   : > { %724 = vmatmul.mubr.msk.f32.gmra.mrb[2].mxu0 %vm410_vm4, %v471_v27  ;;  %728 = vmatmul.mubr.msk.f32.gmra.mrb[2].mxu1 %vm410_vm4, %v475_v33 }
 0x158   : > { %584 = vmatprep.mubr.f32.mxu0 %v1067_v0  ;;  %608 = vmatprep.mubr.f32.mxu1 %v1067_v0 }
 0x15b   : > { %725 = vmatmul.mubr.msk.f32.gmra.mrb[4].mxu0 %vm410_vm4, %v472_v34  ;;  %729 = vmatmul.mubr.msk.f32.gmra.mrb[4].mxu1 %vm410_vm4, %v476_v7 }
 0x15c   : > { %590 = vmatprep.mubr.f32.mxu0 %v1067_v0  ;;  %614 = vmatprep.mubr.f32.mxu1 %v1067_v0 }
 0x15f   : > { %726 = vmatmul.mubr.msk.f32.gmra.mrb[6].mxu0 %vm410_vm4, %v473_v35  ;;  %730 = vmatmul.mubr.msk.f32.gmra.mrb[6].mxu1 %vm410_vm4, %v477_v8 }
 0x226   : > { %v574_v36 = vpop.f32.mrb[0].mxu0  ;;  %v598_v38 = vpop.f32.mrb[0].mxu1 }
 0x227   : > { %621 = vst [vmem:[%s1387_s24] sm:$0xff] %v574_v36  ;;  %630 = vst [vmem:[%s1387_s24 + $0x40] sm:$0xff] %v598_v38  ;;  %v576_v0 = vpop.f32.mrb[1].mxu0  ;;  %v600_v39 = vpop.f32.mrb[1].mxu1 }
 0x228   : > { %623 = vst.msk [vmem:[%s1387_s24 + $0x8] sm:$0xff] %vm622_vm0, %v576_v0  ;;  %631 = vst.msk [vmem:[%s1387_s24 + $0x48] sm:$0xff] %vm622_vm0, %v600_v39 }
 0x22a   : > { %v580_v42 = vpop.f32.mrb[2].mxu0  ;;  %v604_v43 = vpop.f32.mrb[2].mxu1 }
 0x22b   : > { %624 = vst [vmem:[%s1387_s24 + $0x10] sm:$0xff] %v580_v42  ;;  %632 = vst [vmem:[%s1387_s24 + $0x50] sm:$0xff] %v604_v43  ;;  %v582_v44 = vpop.f32.mrb[3].mxu0  ;;  %v606_v45 = vpop.f32.mrb[3].mxu1 }
 0x22c   : > { %625 = vst.msk [vmem:[%s1387_s24 + $0x18] sm:$0xff] %vm622_vm0, %v582_v44  ;;  %633 = vst.msk [vmem:[%s1387_s24 + $0x58] sm:$0xff] %vm622_vm0, %v606_v45 }
 0x22e   : > { %v586_v47 = vpop.f32.mrb[4].mxu0  ;;  %v610_v37 = vpop.f32.mrb[4].mxu1 }
 0x22f   : > { %626 = vst [vmem:[%s1387_s24 + $0x20] sm:$0xff] %v586_v47  ;;  %634 = vst [vmem:[%s1387_s24 + $0x60] sm:$0xff] %v610_v37  ;;  %v588_v48 = vpop.f32.mrb[5].mxu0  ;;  %v612_v49 = vpop.f32.mrb[5].mxu1 }
 0x230   : > { %627 = vst.msk [vmem:[%s1387_s24 + $0x28] sm:$0xff] %vm622_vm0, %v588_v48  ;;  %635 = vst.msk [vmem:[%s1387_s24 + $0x68] sm:$0xff] %vm622_vm0, %v612_v49 }
 0x232   : > { %v592_v50 = vpop.f32.mrb[6].mxu0  ;;  %v616_v51 = vpop.f32.mrb[6].mxu1 }
 0x233   : > { %628 = vst [vmem:[%s1387_s24 + $0x30] sm:$0xff] %v592_v50  ;;  %636 = vst [vmem:[%s1387_s24 + $0x70] sm:$0xff] %v616_v51  ;;  %v594_v52 = vpop.f32.mrb[7].mxu0  ;;  %v618_v53 = vpop.f32.mrb[7].mxu1 }
 0x234   : > { %629 = vst.msk [vmem:[%s1387_s24 + $0x38] sm:$0xff] %vm622_vm0, %v594_v52  ;;  %637 = vst.msk [vmem:[%s1387_s24 + $0x78] sm:$0xff] %vm622_vm0, %v618_v53 }
 0x235   : > { %998 = shalt.err (!%p995_p3)
}
 0x236   : > { %s999_s6 = scalar_lea.hbm %s1412_s29, 2048  ;;  %s1003_s14 = scalar_lea.hbm %s1467_s2, 4096 }
 0x237   : > { %p1000_p4 = scmp.ne.s32.totalorder %s1412_s29, %s999_s6  ;;  %p1004_p9 = scmp.lt.u32.totalorder %s1412_s29, %s1467_s2 }
 0x238   : > { %p1005_p10 = scmp.lt.u32.totalorder %s1003_s14, %s999_s6  ;;  %p1007_p12 = scmp.lt.u32.totalorder %s999_s6, %s1412_s29 }
 0x239   : > { %p1001_p7 = pnand %p1000_p4, %p1125_p5 }
 0x23a   : > { %p1006_p11 = por %p1005_p10, %p1004_p9 }
 0x23b   : > { %p1002_p8 = pneg %p1001_p7 }
 0x23c   : > { %p1008_p13 = por %p1007_p12, %p1006_p11 }
 0x23e   : > { %p1009_p0 = pnand %p1008_p13, %p1002_p8 }
 0x240   : > { %1012 = shalt.err (!%p1009_p0)
}
 0x241   : > { %s1070_s21 = smov 256   ;;  %s1071_s22 = smov 16  }
 0x242   : > { %752 = dma.vmem_to_hbm [thread:$0]  (%p1125_p5), %s1414_s26, 2048, %s1412_s29, %s1424_s13, %s1070_s21, %s1070_s21, %s1071_s22  }
 0x243 PF: > { %p758_p1 = scmp.ge.s32.totalorder %s1047_s12, 2  ;;  %s667_s23 = sand.u32 1, %s1035_s9  }
 0x244   : > { %s668_s24 = scalar_lea.sflag [#allocation3], %s667_s23 }
 0x245   : > { %p755_p2 = pnand %p758_p1, %p1129_p6 }
 0x247   : > { %1030 = dma.done.wait (!%p755_p2), %s668_s24, 2048  }
 0x248   : > { %1032 = vsyncadd (!%p755_p2), %s668_s24, 4294965248  ;;  %p12_p3 = scmp.ge.s32.totalorder %s1112_s15, 4   ;;  %s1470_s9 = smov %s1039_s10 }
 0x249   : > { %s1471_s10 = smov %s1043_s11  ;;  %s1472_s11 = smov %s1123_s18 }
 0x24a   : > { %s1473_s12 = smov %s1112_s15  ;;  %14 = sbr.rel (!%p12_p3) target bundleno = 3 (0x3), region = 63 }
 0x251   :  { %673 = vsyncpa [#allocation3], 1 }
 0x252   :  { %675 = vsyncpa [#allocation3 + $0x1], 1 }

</bundles_post_ra>
